<compile_context>
chip_gen: v5e
topology: v5e:2x2
jax: 0.10.0
libtpu: 0.0.40
codegen_flags: <defaults>
</compile_context>

<pallas_src>
import functools

import jax
import jax.numpy as jnp
from jax.experimental import pallas as pl
from jax.experimental.pallas import tpu as pltpu


# --------------------------------------------------------------------------- #
# Kernels
# --------------------------------------------------------------------------- #
def _pool_head_single_kernel(x_ref, w_ref, b_ref, o_ref, *, inv_s):
    """Single spatial step: whole (tb, C, S) tile resident -> reduce + head."""
    pooled = jnp.sum(x_ref[...].astype(jnp.float32), axis=-1) * inv_s        # (tb, C)
    logits = jnp.dot(pooled, w_ref[...].astype(jnp.float32),
                     preferred_element_type=jnp.float32)
    o_ref[...] = (logits + b_ref[...].astype(jnp.float32)).astype(o_ref.dtype)


def _pool_head_acc_kernel(x_ref, w_ref, b_ref, o_ref, acc_ref, *, inv_s, n_chunks):
    """Multi spatial step path.

    x_ref:   (tb, C, ts)   input tile (ts % 128 == 0)
    w_ref:   (C, NCLS_P)   head weight (lane-padded classes)
    b_ref:   (1, NCLS_P)
    o_ref:   (tb, NCLS_P)
    acc_ref: (tb, C, 128)  f32 lane-parallel partial-sum accumulator, resident
                           across the spatial ("arbitrary") grid axis.
    """
    s_idx = pl.program_id(1)

    @pl.when(s_idx == 0)
    def _init():
        acc_ref[...] = jnp.zeros_like(acc_ref)

    # Hot loop: lane-parallel accumulation.  Each 128-wide lane-aligned chunk
    # add is a plain VPU op; no per-step cross-lane (XLU) reduce or relayout.
    x = x_ref[...].astype(jnp.float32)
    acc = acc_ref[...]
    for k in range(n_chunks):                         # unrolled at trace time
        acc = acc + x[:, :, k * 128:(k + 1) * 128]
    acc_ref[...] = acc

    @pl.when(s_idx == pl.num_programs(1) - 1)
    def _finalize():
        # One cross-lane reduce per batch block (not one per spatial step).
        pooled = jnp.sum(acc_ref[...], axis=-1) * inv_s                       # (tb, C)
        logits = jnp.dot(pooled, w_ref[...].astype(jnp.float32),
                         preferred_element_type=jnp.float32)
        o_ref[...] = (logits + b_ref[...].astype(jnp.float32)).astype(o_ref.dtype)


# --------------------------------------------------------------------------- #
# Tiling / VMEM policy
# --------------------------------------------------------------------------- #
def _physical_vmem_bytes():
    """Generation-aware physical VMEM size; conservative (v7x-sized) fallback."""
    try:
        info = pltpu.get_tpu_info()
        cap = int(getattr(info, "vmem_capacity_bytes", 0) or 0)
        if cap > 0:
            return cap
    except Exception:
        pass
    return 64 << 20  # v7x size; safe lower bound on every generation


def _select_tiles(B, C, S, x_itemsize, x_budget_bytes):
    """Pick (tb, ts) for this HBM-bandwidth-bound kernel.

    * prefer ts = S (one fully contiguous HBM region per batch block) and
      shrink tb before shrinking ts;
    * tb must be a multiple of 8 (output sublane rule) or the full batch;
    * keep the batch grid length >= 2 when possible so the "parallel" axis can
      spread over both TensorCores on v7x.
    """
    if B % 8 != 0:
        tb_candidates = [B]                           # full-extent block is legal
    else:
        cands = [t for t in (64, 32, 16, 8) if B % t == 0 and B // t >= 2]
        tb_candidates = cands if cands else [8]

    for tb in tb_candidates:                          # largest tb first
        if 2 * tb * C * S * x_itemsize <= x_budget_bytes:
            return tb, S

    tb = tb_candidates[-1]                            # smallest allowed tb
    if S % 128 != 0:
        return tb, S                                  # must take the full extent
    n128 = S // 128
    ts = 128
    for m in range(n128, 0, -1):                      # largest fitting 128-multiple
        if n128 % m == 0 and 2 * tb * C * m * 128 * x_itemsize <= x_budget_bytes:
            ts = m * 128
            break
    return tb, ts


# --------------------------------------------------------------------------- #
# Wrapper (wrapped-classifier forward: GAP + linear head)
# --------------------------------------------------------------------------- #
def model_wrapper_forward(x_nchw, w_head, b_head, *, spatial_tile=None, batch_tile=None):
    """x_nchw: (B, C, H, W); w_head: (C, NUM_CLS); b_head: (NUM_CLS,) -> (B, NUM_CLS) f32."""
    B, C, H, W = x_nchw.shape
    S = H * W
    num_cls = w_head.shape[1]

    # Free reshape (NCHW is contiguous over H,W): spatial axis -> lanes.
    x_bcs = x_nchw.reshape(B, C, S)

    # Pad head to a lane-dense class axis (multiple of 128) -> unmasked vst.
    ncls_p = max(128, ((num_cls + 127) // 128) * 128)
    if ncls_p != num_cls:
        w_p = jnp.zeros((C, ncls_p), w_head.dtype).at[:, :num_cls].set(w_head)
        b_p = jnp.zeros((1, ncls_p), b_head.dtype).at[:, :num_cls].set(b_head.reshape(1, -1))
    else:
        w_p = w_head
        b_p = b_head.reshape(1, num_cls)

    x_itemsize = jnp.dtype(x_nchw.dtype).itemsize
    p_itemsize = jnp.dtype(w_head.dtype).itemsize

    # Generation-aware VMEM budget: ~55% of physical (v7x: ~35 MiB, v5e/v6e: ~70 MiB).
    phys_vmem = _physical_vmem_bytes()
    vmem_cap = int(phys_vmem * 0.55)
    x_budget = int(vmem_cap * 0.65)

    tb_auto, ts_auto = _select_tiles(B, C, S, x_itemsize, x_budget)
    tb = batch_tile if batch_tile is not None else tb_auto
    ts = spatial_tile if spatial_tile is not None else ts_auto
    assert B % tb == 0 and S % ts == 0, (B, tb, S, ts)

    n_s = S // ts
    multi_step = n_s > 1
    if multi_step:
        assert ts % 128 == 0, ts
    n_chunks = ts // 128 if multi_step else 0
    inv_s = 1.0 / S

    def _build_and_run(single_buffer_params):
        if multi_step:
            kernel = functools.partial(_pool_head_acc_kernel, inv_s=inv_s, n_chunks=n_chunks)
            grid = (B // tb, n_s)                                # reduction axis last
            x_spec = pl.BlockSpec((tb, C, ts), lambda b, s: (b, 0, s))
            out_spec = pl.BlockSpec((tb, ncls_p), lambda b, s: (b, 0))
            const_idx = lambda b, s: (0, 0)
            scratch = [pltpu.VMEM((tb, C, 128), jnp.float32)]
            semantics = ("parallel", "arbitrary")
        else:
            kernel = functools.partial(_pool_head_single_kernel, inv_s=inv_s)
            grid = (B // tb,)
            x_spec = pl.BlockSpec((tb, C, ts), lambda b: (b, 0, 0))
            out_spec = pl.BlockSpec((tb, ncls_p), lambda b: (b, 0))
            const_idx = lambda b: (0, 0)
            scratch = []
            semantics = ("parallel",)

        if single_buffer_params:
            # Head params are grid-constant: single-buffer them so the reclaimed
            # VMEM can go to the x tiles that set HBM throughput.
            w_spec = pl.BlockSpec((C, ncls_p), const_idx, pipeline_mode=pl.Buffered(1))
            b_spec = pl.BlockSpec((1, ncls_p), const_idx, pipeline_mode=pl.Buffered(1))
            n_param_bufs = 1
        else:
            w_spec = pl.BlockSpec((C, ncls_p), const_idx)
            b_spec = pl.BlockSpec((1, ncls_p), const_idx)
            n_param_bufs = 2

        # Scoped VMEM request with real dtypes; raise the cap (up to ~85% of
        # physical) rather than silently clamping for very large C / num_cls.
        vmem_est = (2 * tb * C * ts * x_itemsize                     # x (double-buffered)
                    + n_param_bufs * (C + 1) * ncls_p * p_itemsize   # W + bias
                    + (tb * C * 128 * 4 if multi_step else 0)        # accumulator scratch
                    + 2 * tb * ncls_p * 4                            # output tiles
                    + (2 << 20))                                     # headroom
        if vmem_est > vmem_cap:
            vmem_bytes = int(min(vmem_est, int(phys_vmem * 0.85)))
        else:
            vmem_bytes = int(min(max(vmem_est, 16 << 20), vmem_cap))
        # TODO(synk): for extreme C where even the minimum (tb, C, 128) tile
        # overflows VMEM, add a C grid axis; not needed for typical backbones.

        out = pl.pallas_call(
            kernel,
            out_shape=jax.ShapeDtypeStruct((B, ncls_p), jnp.float32),
            grid_spec=pltpu.PrefetchScalarGridSpec(
                num_scalar_prefetch=0,
                grid=grid,
                in_specs=[x_spec, w_spec, b_spec],
                out_specs=out_spec,
                scratch_shapes=scratch,
            ),
            compiler_params=pltpu.CompilerParams(
                dimension_semantics=semantics,
                vmem_limit_bytes=vmem_bytes,
            ),
        )(x_bcs, w_p, b_p)
        return jax.block_until_ready(out)

    try:
        out = _build_and_run(True)
    except Exception:
        # pipeline_mode / Buffered(1) unsupported on this jax build: fall back
        # to default double-buffered constant params (correctness identical).
        out = _build_and_run(False)

    return out[:, :num_cls]


if __name__ == "__main__":
    # small shapes consistent with the wrapped-classifier forward
    B, C, H, W = 2, 4, 16, 16
    NUM_CLS = 8  # dynamic_cfg["cls_num"]

    key = jax.random.PRNGKey(0)
    kx, kw, kb = jax.random.split(key, 3)
    x = jax.random.normal(kx, (B, C, H, W), dtype=jnp.float32)
    # deterministic synthetic head parameters (classifier head replaced for cls_num)
    w_head = jax.random.normal(kw, (C, NUM_CLS), dtype=jnp.float32) * 0.05
    b_head = jax.random.normal(kb, (NUM_CLS,), dtype=jnp.float32) * 0.01

    # reference in plain JAX
    pooled_ref = jnp.mean(x, axis=(2, 3))                     # (B, C)
    logits_ref = pooled_ref @ w_head + b_head                 # (B, NUM_CLS)

    # (1) forced 128-wide spatial tile -> 2 reduction steps: exercises the
    #     lane-parallel accumulator / pl.when init+finalize path.
    logits_multi = model_wrapper_forward(x, w_head, b_head, spatial_tile=128)
    # (2) auto-picked tiling: full-S contiguous block, single-step kernel.
    logits_auto = model_wrapper_forward(x, w_head, b_head)
    jax.block_until_ready((logits_multi, logits_auto))

    assert logits_multi.shape == (B, NUM_CLS)
    assert logits_auto.shape == (B, NUM_CLS)
    assert jnp.allclose(logits_multi, logits_ref, atol=1e-4, rtol=1e-4)
    assert jnp.allclose(logits_auto, logits_ref, atol=1e-4, rtol=1e-4)

    print("KERNEL_OK")
</pallas_src>

<mosaic_0001>
module attributes {stable_mosaic.version = 11 : i64} {
  func.func @_pool_head_acc_kernel(%arg0: i32, %arg1: i32, %arg2: memref<2x4x128xf32, #tpu.memory_space<vmem>>, %arg3: memref<4x128xf32, #tpu.memory_space<vmem>>, %arg4: memref<1x128xf32, #tpu.memory_space<vmem>>, %arg5: memref<2x128xf32, #tpu.memory_space<vmem>>, %arg6: memref<2x4x128xf32, #tpu.memory_space<vmem>>) attributes {dimension_semantics = [#tpu.dimension_semantics<parallel>, #tpu.dimension_semantics<arbitrary>], iteration_bounds = array<i64: 1, 2>, scalar_prefetch = 0 : i64, scratch_operands = 1 : i64, tpu.core_type = #tpu.core_type<tc>, window_params = [{transform_indices = @transform_0, window_bounds = array<i64: 2, 4, 128>}, {pipeline_mode = #tpu.pipeline_mode<synchronous>, transform_indices = @transform_1, window_bounds = array<i64: 4, 128>}, {pipeline_mode = #tpu.pipeline_mode<synchronous>, transform_indices = @transform_2, window_bounds = array<i64: 1, 128>}, {transform_indices = @transform_3, window_bounds = array<i64: 2, 128>}]} {
    %c0_i32 = arith.constant 0 : i32
    %0 = arith.cmpi eq, %arg1, %c0_i32 : i32
    %1 = arith.extui %0 : i1 to i32
    %c0_i32_0 = arith.constant 0 : i32
    %2 = arith.cmpi ne, %1, %c0_i32_0 : i32
    scf.if %2 {
      %cst = arith.constant 0.000000e+00 : f32
      %10 = vector.broadcast %cst : f32 to vector<2x4x128xf32>
      %c0_10 = arith.constant 0 : index
      %c0_11 = arith.constant 0 : index
      %c0_12 = arith.constant 0 : index
      %11 = vector.load %arg6[%c0_10, %c0_11, %c0_12] : memref<2x4x128xf32, #tpu.memory_space<vmem>>, vector<2x4x128xf32>
      tpu.vector_store %arg6[%c0_10, %c0_11, %c0_12], %10 {strides = array<i32>} : memref<2x4x128xf32, #tpu.memory_space<vmem>>, vector<2x4x128xf32>,
    } else {
    }
    %c0 = arith.constant 0 : index
    %c0_1 = arith.constant 0 : index
    %c0_2 = arith.constant 0 : index
    %3 = vector.load %arg2[%c0, %c0_1, %c0_2] : memref<2x4x128xf32, #tpu.memory_space<vmem>>, vector<2x4x128xf32>
    %c0_3 = arith.constant 0 : index
    %c0_4 = arith.constant 0 : index
    %c0_5 = arith.constant 0 : index
    %4 = vector.load %arg6[%c0_3, %c0_4, %c0_5] : memref<2x4x128xf32, #tpu.memory_space<vmem>>, vector<2x4x128xf32>
    %5 = arith.addf %4, %3 : vector<2x4x128xf32>
    %c0_6 = arith.constant 0 : index
    %c0_7 = arith.constant 0 : index
    %c0_8 = arith.constant 0 : index
    %6 = vector.load %arg6[%c0_6, %c0_7, %c0_8] : memref<2x4x128xf32, #tpu.memory_space<vmem>>, vector<2x4x128xf32>
    tpu.vector_store %arg6[%c0_6, %c0_7, %c0_8], %5 {strides = array<i32>} : memref<2x4x128xf32, #tpu.memory_space<vmem>>, vector<2x4x128xf32>,
    %c1_i32 = arith.constant 1 : i32
    %7 = arith.cmpi eq, %arg1, %c1_i32 : i32
    %8 = arith.extui %7 : i1 to i32
    %c0_i32_9 = arith.constant 0 : i32
    %9 = arith.cmpi ne, %8, %c0_i32_9 : i32
    scf.if %9 {
      %c0_10 = arith.constant 0 : index
      %c0_11 = arith.constant 0 : index
      %c0_12 = arith.constant 0 : index
      %10 = vector.load %arg6[%c0_10, %c0_11, %c0_12] : memref<2x4x128xf32, #tpu.memory_space<vmem>>, vector<2x4x128xf32>
      %cst = arith.constant dense<0.000000e+00> : vector<2x4xf32>
      %11 = vector.multi_reduction <add>, %10, %cst [2] : vector<2x4x128xf32> to vector<2x4xf32>
      %cst_13 = arith.constant 3.906250e-03 : f32
      %12 = vector.broadcast %cst_13 : f32 to vector<2x4xf32>
      %13 = arith.mulf %11, %12 : vector<2x4xf32>
      %c0_14 = arith.constant 0 : index
      %c0_15 = arith.constant 0 : index
      %14 = vector.load %arg3[%c0_14, %c0_15] : memref<4x128xf32, #tpu.memory_space<vmem>>, vector<4x128xf32>
      %cst_16 = arith.constant dense<0.000000e+00> : vector<2x128xf32>
      %15 = tpu.matmul %13, %14, %cst_16 {dimension_numbers = #tpu.dot_dimension_numbers<[1], [0], [0], [1], [0, 0, 1, 1], [], []>} : vector<2x4xf32>, vector<4x128xf32>, vector<2x128xf32> -> vector<2x128xf32>
      %c0_17 = arith.constant 0 : index
      %c0_18 = arith.constant 0 : index
      %16 = vector.load %arg4[%c0_17, %c0_18] : memref<1x128xf32, #tpu.memory_space<vmem>>, vector<1x128xf32>
      %17 = vector.broadcast %16 : vector<1x128xf32> to vector<2x128xf32>
      %18 = arith.addf %15, %17 : vector<2x128xf32>
      %c0_19 = arith.constant 0 : index
      %c0_20 = arith.constant 0 : index
      %19 = vector.load %arg5[%c0_19, %c0_20] : memref<2x128xf32, #tpu.memory_space<vmem>>, vector<2x128xf32>
      tpu.vector_store %arg5[%c0_19, %c0_20], %18 {strides = array<i32>} : memref<2x128xf32, #tpu.memory_space<vmem>>, vector<2x128xf32>,
    } else {
    }
    return
  }
  func.func @transform_0(%arg0: i32, %arg1: i32) -> (i32, i32, i32) {
    %c0_i32 = arith.constant 0 : i32
    %c0_i32_0 = arith.constant 0 : i32
    return %arg0, %c0_i32, %arg1 : i32, i32, i32
  }
  func.func @transform_1(%arg0: i32, %arg1: i32) -> (i32, i32) {
    %c0_i32 = arith.constant 0 : i32
    %c0_i32_0 = arith.constant 0 : i32
    %c0_i32_1 = arith.constant 0 : i32
    return %c0_i32, %c0_i32_0 : i32, i32
  }
  func.func @transform_2(%arg0: i32, %arg1: i32) -> (i32, i32) {
    %c0_i32 = arith.constant 0 : i32
    %c0_i32_0 = arith.constant 0 : i32
    %c0_i32_1 = arith.constant 0 : i32
    return %c0_i32, %c0_i32_0 : i32, i32
  }
  func.func @transform_3(%arg0: i32, %arg1: i32) -> (i32, i32) {
    %c0_i32 = arith.constant 0 : i32
    %c0_i32_0 = arith.constant 0 : i32
    return %arg0, %c0_i32 : i32, i32
  }
}

module attributes {stable_mosaic.version = 11 : i64} {
  func.func @_pool_head_acc_kernel(%arg0: i32, %arg1: i32, %arg2: memref<2x4x128xf32, #tpu.memory_space<vmem>>, %arg3: memref<4x128xf32, #tpu.memory_space<vmem>>, %arg4: memref<1x128xf32, #tpu.memory_space<vmem>>, %arg5: memref<2x128xf32, #tpu.memory_space<vmem>>, %arg6: memref<2x4x128xf32, #tpu.memory_space<vmem>>) attributes {dimension_semantics = [#tpu.dimension_semantics<parallel>, #tpu.dimension_semantics<arbitrary>], iteration_bounds = array<i64: 1, 2>, scalar_prefetch = 0 : i64, scratch_operands = 1 : i64, tpu.core_type = #tpu.core_type<tc>, window_params = [{transform_indices = @transform_0, window_bounds = array<i64: 2, 4, 128>}, {pipeline_mode = #tpu.pipeline_mode<synchronous>, transform_indices = @transform_1, window_bounds = array<i64: 4, 128>}, {pipeline_mode = #tpu.pipeline_mode<synchronous>, transform_indices = @transform_2, window_bounds = array<i64: 1, 128>}, {transform_indices = @transform_3, window_bounds = array<i64: 2, 128>}]} {
    %c0_i32 = arith.constant 0 : i32
    %0 = arith.cmpi eq, %arg1, %c0_i32 : i32
    %1 = arith.extui %0 : i1 to i32
    %c0_i32_0 = arith.constant 0 : i32
    %2 = arith.cmpi ne, %1, %c0_i32_0 : i32
    scf.if %2 {
      %cst = arith.constant 0.000000e+00 : f32
      %10 = vector.broadcast %cst : f32 to vector<2x4x128xf32>
      %c0_10 = arith.constant 0 : index
      %c0_11 = arith.constant 0 : index
      %c0_12 = arith.constant 0 : index
      %11 = vector.load %arg6[%c0_10, %c0_11, %c0_12] : memref<2x4x128xf32, #tpu.memory_space<vmem>>, vector<2x4x128xf32>
      tpu.vector_store %arg6[%c0_10, %c0_11, %c0_12], %10 {strides = array<i32>} : memref<2x4x128xf32, #tpu.memory_space<vmem>>, vector<2x4x128xf32>,
    } else {
    }
    %c0 = arith.constant 0 : index
    %c0_1 = arith.constant 0 : index
    %c0_2 = arith.constant 0 : index
    %3 = vector.load %arg2[%c0, %c0_1, %c0_2] : memref<2x4x128xf32, #tpu.memory_space<vmem>>, vector<2x4x128xf32>
    %c0_3 = arith.constant 0 : index
    %c0_4 = arith.constant 0 : index
    %c0_5 = arith.constant 0 : index
    %4 = vector.load %arg6[%c0_3, %c0_4, %c0_5] : memref<2x4x128xf32, #tpu.memory_space<vmem>>, vector<2x4x128xf32>
    %5 = arith.addf %4, %3 : vector<2x4x128xf32>
    %c0_6 = arith.constant 0 : index
    %c0_7 = arith.constant 0 : index
    %c0_8 = arith.constant 0 : index
    %6 = vector.load %arg6[%c0_6, %c0_7, %c0_8] : memref<2x4x128xf32, #tpu.memory_space<vmem>>, vector<2x4x128xf32>
    tpu.vector_store %arg6[%c0_6, %c0_7, %c0_8], %5 {strides = array<i32>} : memref<2x4x128xf32, #tpu.memory_space<vmem>>, vector<2x4x128xf32>,
    %c1_i32 = arith.constant 1 : i32
    %7 = arith.cmpi eq, %arg1, %c1_i32 : i32
    %8 = arith.extui %7 : i1 to i32
    %c0_i32_9 = arith.constant 0 : i32
    %9 = arith.cmpi ne, %8, %c0_i32_9 : i32
    scf.if %9 {
      %c0_10 = arith.constant 0 : index
      %c0_11 = arith.constant 0 : index
      %c0_12 = arith.constant 0 : index
      %10 = vector.load %arg6[%c0_10, %c0_11, %c0_12] : memref<2x4x128xf32, #tpu.memory_space<vmem>>, vector<2x4x128xf32>
      %cst = arith.constant dense<0.000000e+00> : vector<2x4xf32>
      %11 = vector.multi_reduction <add>, %10, %cst [2] : vector<2x4x128xf32> to vector<2x4xf32>
      %cst_13 = arith.constant 3.906250e-03 : f32
      %12 = vector.broadcast %cst_13 : f32 to vector<2x4xf32>
      %13 = arith.mulf %11, %12 : vector<2x4xf32>
      %c0_14 = arith.constant 0 : index
      %c0_15 = arith.constant 0 : index
      %14 = vector.load %arg3[%c0_14, %c0_15] : memref<4x128xf32, #tpu.memory_space<vmem>>, vector<4x128xf32>
      %cst_16 = arith.constant dense<0.000000e+00> : vector<2x128xf32>
      %15 = tpu.matmul %13, %14, %cst_16 {dimension_numbers = #tpu.dot_dimension_numbers<[1], [0], [0], [1], [0, 0, 1, 1], [], []>} : vector<2x4xf32>, vector<4x128xf32>, vector<2x128xf32> -> vector<2x128xf32>
      %c0_17 = arith.constant 0 : index
      %c0_18 = arith.constant 0 : index
      %16 = vector.load %arg4[%c0_17, %c0_18] : memref<1x128xf32, #tpu.memory_space<vmem>>, vector<1x128xf32>
      %17 = vector.broadcast %16 : vector<1x128xf32> to vector<2x128xf32>
      %18 = arith.addf %15, %17 : vector<2x128xf32>
      %c0_19 = arith.constant 0 : index
      %c0_20 = arith.constant 0 : index
      %19 = vector.load %arg5[%c0_19, %c0_20] : memref<2x128xf32, #tpu.memory_space<vmem>>, vector<2x128xf32>
      tpu.vector_store %arg5[%c0_19, %c0_20], %18 {strides = array<i32>} : memref<2x128xf32, #tpu.memory_space<vmem>>, vector<2x128xf32>,
    } else {
    }
    return
  }
  func.func @transform_0(%arg0: i32, %arg1: i32) -> (i32, i32, i32) {
    %c0_i32 = arith.constant 0 : i32
    %c0_i32_0 = arith.constant 0 : i32
    return %arg0, %c0_i32, %arg1 : i32, i32, i32
  }
  func.func @transform_1(%arg0: i32, %arg1: i32) -> (i32, i32) {
    %c0_i32 = arith.constant 0 : i32
    %c0_i32_0 = arith.constant 0 : i32
    %c0_i32_1 = arith.constant 0 : i32
    return %c0_i32, %c0_i32_0 : i32, i32
  }
  func.func @transform_2(%arg0: i32, %arg1: i32) -> (i32, i32) {
    %c0_i32 = arith.constant 0 : i32
    %c0_i32_0 = arith.constant 0 : i32
    %c0_i32_1 = arith.constant 0 : i32
    return %c0_i32, %c0_i32_0 : i32, i32
  }
  func.func @transform_3(%arg0: i32, %arg1: i32) -> (i32, i32) {
    %c0_i32 = arith.constant 0 : i32
    %c0_i32_0 = arith.constant 0 : i32
    return %arg0, %c0_i32 : i32, i32
  }
}

</mosaic_0001>

<bundles_post_ra>
// kernel: tpu_custom_call.1
= control target key start
LH: loop header
LB: loop body
LE: loop exit
PB: predicated region body
PF: predicated region fallthrough
CT: control target
= control target key end

     0   :  { %8 = vsyncpa [#allocation4], 0  ;;  %s764_s0 = inlined_call_operand.hbm [shape: f32[2,4,256], index: 0, kind: input, shape index: {}]   ;;  %s765_s1 = inlined_call_operand.hbm [shape: f32[4,128], index: 1, kind: input, shape index: {}]   ;;  %s766_s2 = inlined_call_operand.vmem [shape: f32[1,128], index: 2, kind: input, shape index: {}]   ;;  %s767_s3 = inlined_call_operand.hbm [shape: f32[2,128], index: 3, kind: output, shape index: {}]  }
   0x1   :  { %10 = vsyncpa [#allocation4 + $0x1], 0 }
   0x2   :  { %11 = vsyncpa [#allocation7], 0 }
   0x3   :  { %12 = vsyncpa [#allocation5], 0  ;;  %s638_s12 = smov 0   ;;  %s640_s13 = smov 0  }
   0x4   :  { %s642_s14 = smov 0   ;;  %s644_s15 = smov 0  }
   0x5   :  { %s646_s16 = smov 0   ;;  %s648_s17 = smov 0  }
   0x6 LB: > { %s369_s18 = sadd.s32 4294967295, %s610_s17   ;;  %s39_s19 = sadd.s32 1, %s598_s14  ;;  %s610_s17 = sphi %s648_s17, %s18_s17   ;;  %s606_s16 = sphi %s646_s16, %s777_s16   ;;  %s602_s15 = sphi %s644_s15, %s776_s15   ;;  %s598_s14 = sphi %s642_s14, %s775_s14   ;;  %s594_s13 = sphi %s640_s13, %s774_s13   ;;  %s590_s12 = sphi %s638_s12, %s773_s12  }
   0x7   : > { %p46_p0 = scmp.ne.s32.totalorder %s598_s14, %s594_s13  ;;  %p47_p1 = scmp.eq.s32.totalorder %s610_s17, 0 }
   0x8   : > { %p52_p2 = scmp.ne.s32.totalorder %s594_s13, %s590_s12  ;;  %p674_p3 = scmp.eq.s32.totalorder %s369_s18, 0 }
   0x9   : > { %p678_p4 = por %p47_p1, %p46_p0  ;;  %p370_p5 = scmp.ge.s32.totalorder %s610_s17, 1 }
   0xa   : > { %p685_p6 = por %p674_p3, %p52_p2  ;;  %p131_p7 = scmp.lt.s32.totalorder %s610_s17, 3 }
   0xb   : > { %s143_s25 = sshll.u32 %s765_s1, 4  ;;  %s612_s27 = smov [#allocation6]   ;;  %s144_s25 = int_to_ptr.hbm [resolvable:$true] %s143_s25 }
   0xc   : > { %p693_p8 = pnand %p370_p5, %p131_p7  ;;  %s145_s28 = sshll.u32 %s612_s27, 4  ;;  %s146_s28 = int_to_ptr.vmem [resolvable:$true] %s145_s28 }
   0xd   : > { %p405_p10 = scmp.lt.s32.totalorder %s610_s17, 2  ;;  %s27_s30 = sadd.s32 1, %s606_s16 }
   0xe   : > { %p396_p9 = pneg %p693_p8  ;;  %p28_p13 = scmp.ge.s32.totalorder %s27_s30, 2 }
   0xf   : > { %p704_p12 = pnand %p405_p10, %p678_p4  ;;  %s159_s4 = sand.u32 1, %s598_s14  }
  0x10   : > { %p397_p11 = pnand %p396_p9, %p674_p3  ;;  %s374_s5 = sshll.u32 %s606_s16, 2 }
  0x11   : > { %s779_s30 = smov (%p28_p13, %s27_s30), 0  ;;  %s373_s6 = sshll.u32 %s159_s4, 3 }
  0x12   : > { %399 = dma.hbm_to_vmem [thread:$0]  (!%p397_p11), %s144_s25, 64, %s146_s28, [#allocation7]  }
  0x13   : > { %s35_s7 = ssub.s32 %s606_s16, %s779_s30  ;;  %s170_s10 = scalar_lea.hbm %s764_s0, %s374_s5 }
  0x14   : > { %p37_p0 = scmp.eq.s32.totalorder %s35_s7, 0  ;;  %s171_s11 = sshll.u32 %s170_s10, 4  ;;  %s172_s11 = int_to_ptr.hbm [resolvable:$true] %s171_s11 }
  0x15   : > { %s163_s12 = scalar_lea.vmem [#allocation3], %s373_s6  ;;  %s160_s24 = scalar_lea.sflag [#allocation4], %s159_s4 }
  0x16   : > { %s173_s21 = sshll.u32 %s163_s12, 4  ;;  %s613_s25 = smov 128   ;;  %s174_s21 = int_to_ptr.vmem [resolvable:$true] %s173_s21 }
  0x17   : > { %s721_s23 = scalar_select %p37_p0, %s598_s14, %s39_s19  }
  0x18   : > { %s614_s27 = smov 64   ;;  %s615_s28 = smov 4  }
  0x19   : > { %403 = dma.hbm_to_vmem [thread:$0]  (!%p704_p12), %s172_s11, 128, %s174_s21, %s160_s24, %s613_s25, %s614_s27, %s615_s28  }
  0x1a   : > { %185 = sbr.rel (%p693_p8) target bundleno = 325 (0x145), region = 32  ;;  %s187_s5 = sand.u32 (!%p693_p8), 1, %s594_s13  }
  0x1b   : > { %s376_s7 = sshll.u32 (!%p693_p8), %s187_s5, 3  ;;  %s188_s6 = scalar_lea.sflag (!%p693_p8), [#allocation4], %s187_s5 }
  0x1c   : > { %s191_s8 = scalar_lea.vmem (!%p693_p8), [#allocation3], %s376_s7 }
  0x1f   : > { %577 = dma.done.wait (%p685_p6), %s188_s6, 128  }
  0x20   : > { %579 = vsyncadd (%p685_p6), %s188_s6, 4294967168 }
  0x21   : > { %581 = dma.done.wait (%p674_p3), [#allocation7], 64  }
  0x22   : > { %583 = vsyncadd (%p674_p3), [#allocation7], 4294967232  ;;  %p378_p1 = scmp.ne.s32.totalorder %s602_s15, 0 }
  0x24   : > { %219 = sbr.rel (%p378_p1) target bundleno = 44 (0x2c), region = 44 }
  0x29   : > { %v616_v0 = vmov 0.0  }
  0x2a   : > { %220 = vst [vmem:[#allocation2] sm:$0xf] %v616_v0 }
  0x2b   : > { %221 = vst [vmem:[#allocation2 + $0x4] sm:$0xf] %v616_v0 }
  0x2c PF: > { %v222_v1 = vld [vmem:[%s191_s8] sm:$0xf]  ;;  %v223_v3 = vld [vmem:[%s191_s8 + $0x4] sm:$0xf]  ;;  %p379_p2 = scmp.ne.s32.totalorder %s602_s15, 1 }
  0x31   : > { %v224_v2 = vld [vmem:[#allocation2] sm:$0xf]  ;;  %233 = sbr.rel (%p379_p2) target bundleno = 319 (0x13f), region = 48 }
  0x32   : > { %v226_v4 = vadd.f32 %v224_v2, %v222_v1  ;;  %v225_v5 = vld [vmem:[#allocation2 + $0x4] sm:$0xf] }
  0x33   : > { %v227_v6 = vadd.f32 %v225_v5, %v223_v3 }
  0x34   : > { %228 = vst [vmem:[#allocation2] sm:$0xf] %v226_v4 }
  0x35   : > { %229 = vst [vmem:[#allocation2 + $0x4] sm:$0xf] %v227_v6 }
  0x36   : > { %vm236_vm0 = vcmask 1043456   ;;  %v245_v11 = vld [vmem:[#allocation6] sm:$0xf]  ;;  %v252_v13 = vlaneseq  ;;  %vm256_vm1 = vcmask 1041409   ;;  %vm258_vm2 = vcmask 31744  }
  0x37   : > { %380 = vmatpush.msk.msra.mxu0 %vm236_vm0, %v245_v11  ;;  %v463_v21 = vld [vmem:[%s766_s2] ss:$0 sm:$0xff] }
  0x38   : > { %v253_v14 = vand.u32 127, %v252_v13 }
  0x3b   : > { %v234_v7 = vld [vmem:[#allocation2] sm:$0xf] }
  0x3c   : > { %v237_v8 = vsel %vm236_vm0, %v234_v7, 0.0  ;;  %v235_v9 = vld [vmem:[#allocation2 + $0x4] sm:$0xf] }
  0x3d   : > { %238 = vadd.xlane.f32.xlu0 %v237_v8  ;;  %v240_v10 = vsel %vm236_vm0, %v235_v9, 0.0 }
  0x45   : > { %241 = vadd.xlane.f32.xlu0 %v240_v10 }
  0xb0   : > { %v239_v12 = vpop.xlane.xlu0 %238 }
  0xb1   : > { %v243_v15 = vmul.f32 0.00390625, %v239_v12 }
  0xb3   : > { %v254_v18 = vperm.slane %v243_v15, %v253_v14 }
  0xb8   : > { %v242_v16 = vpop.xlane.xlu0 %241 }
  0xb9   : > { %v244_v17 = vmul.f32 0.00390625, %v242_v16 }
  0xbb   : > { %v255_v19 = vperm.slane %v244_v17, %v253_v14 }
  0xbd   : > { %v257_v20 = vsel %vm256_vm1, %v255_v19, %v254_v18 }
  0xbe   : > { %381 = vmatmul.msk.f32.vlgmr.msra.gmra.mxu0 %vm258_vm2, %v257_v20 }
 0x13b   : > { %v281_v22 = vpop.f32.mrf.mxu0 }
 0x13c   : > { %v282_v23 = vadd.f32 %v463_v21, %v281_v22 }
 0x13e   : > { %284 = vst [vmem:[#allocation8] sm:$0x3] %v282_v23 }
 0x13f PF: > { %p407_p3 = scmp.eq.s32.totalorder %s369_s18, 1  ;;  %s295_s26 = sshll.u32 %s767_s3, 4  ;;  %s296_s26 = int_to_ptr.hbm [resolvable:$true] %s295_s26 }
 0x140   : > { %s617_s29 = smov [#allocation8]  }
 0x141   : > { %s293_s4 = sshll.u32 %s617_s29, 4  ;;  %s294_s4 = int_to_ptr.vmem [resolvable:$true] %s293_s4 }
 0x142   : > { %393 = dma.vmem_to_hbm [thread:$0]  (%p407_p3), %s294_s4, 32, %s296_s26, [#allocation5]  }
 0x143   : > { %585 = dma.done.wait (%p407_p3), [#allocation5], 32  }
 0x144   : > { %587 = vsyncadd (%p407_p3), [#allocation5], 4294967264 }
 0x145 PF: > { %s18_s17 = sadd.s32 1, %s610_s17   ;;  %s773_s12 = smov %s594_s13 }
 0x146   : > { %p15_p4 = scmp.ge.s32.totalorder %s18_s17, 4   ;;  %s774_s13 = smov %s598_s14 }
 0x147   : > { %s775_s14 = smov %s721_s23  ;;  %s776_s15 = smov %s606_s16 }
 0x148   : > { %s777_s16 = smov %s779_s30  ;;  %17 = sbr.rel (!%p15_p4) target bundleno = 6 (0x6), region = 82 }
 0x14d   :  { %309 = vsyncpa [#allocation4], 1 }
 0x14e   :  { %311 = vsyncpa [#allocation4 + $0x1], 1 }
 0x14f   :  { %312 = vsyncpa [#allocation7], 1 }
 0x150   :  { %313 = vsyncpa [#allocation5], 1 }
 0x151   :  { %315 = vsyncpa [#allocation5 + $0x1], 1 }

// kernel: tpu_custom_call.1
= control target key start
LH: loop header
LB: loop body
LE: loop exit
PB: predicated region body
PF: predicated region fallthrough
CT: control target
= control target key end

     0   :  { %8 = vsyncpa [#allocation4], 0  ;;  %s764_s0 = inlined_call_operand.hbm [shape: f32[2,4,256], index: 0, kind: input, shape index: {}]   ;;  %s765_s1 = inlined_call_operand.hbm [shape: f32[4,128], index: 1, kind: input, shape index: {}]   ;;  %s766_s2 = inlined_call_operand.vmem [shape: f32[1,128], index: 2, kind: input, shape index: {}]   ;;  %s767_s3 = inlined_call_operand.hbm [shape: f32[2,128], index: 3, kind: output, shape index: {}]  }
   0x1   :  { %10 = vsyncpa [#allocation4 + $0x1], 0 }
   0x2   :  { %11 = vsyncpa [#allocation7], 0 }
   0x3   :  { %12 = vsyncpa [#allocation5], 0  ;;  %s638_s12 = smov 0   ;;  %s640_s13 = smov 0  }
   0x4   :  { %s642_s14 = smov 0   ;;  %s644_s15 = smov 0  }
   0x5   :  { %s646_s16 = smov 0   ;;  %s648_s17 = smov 0  }
   0x6 LB: > { %s369_s18 = sadd.s32 4294967295, %s610_s17   ;;  %s39_s19 = sadd.s32 1, %s598_s14  ;;  %s610_s17 = sphi %s648_s17, %s18_s17   ;;  %s606_s16 = sphi %s646_s16, %s777_s16   ;;  %s602_s15 = sphi %s644_s15, %s776_s15   ;;  %s598_s14 = sphi %s642_s14, %s775_s14   ;;  %s594_s13 = sphi %s640_s13, %s774_s13   ;;  %s590_s12 = sphi %s638_s12, %s773_s12  }
   0x7   : > { %p46_p0 = scmp.ne.s32.totalorder %s598_s14, %s594_s13  ;;  %p47_p1 = scmp.eq.s32.totalorder %s610_s17, 0 }
   0x8   : > { %p52_p2 = scmp.ne.s32.totalorder %s594_s13, %s590_s12  ;;  %p674_p3 = scmp.eq.s32.totalorder %s369_s18, 0 }
   0x9   : > { %p678_p4 = por %p47_p1, %p46_p0  ;;  %p370_p5 = scmp.ge.s32.totalorder %s610_s17, 1 }
   0xa   : > { %p685_p6 = por %p674_p3, %p52_p2  ;;  %p131_p7 = scmp.lt.s32.totalorder %s610_s17, 3 }
   0xb   : > { %s143_s25 = sshll.u32 %s765_s1, 4  ;;  %s612_s27 = smov [#allocation6]   ;;  %s144_s25 = int_to_ptr.hbm [resolvable:$true] %s143_s25 }
   0xc   : > { %p693_p8 = pnand %p370_p5, %p131_p7  ;;  %s145_s28 = sshll.u32 %s612_s27, 4  ;;  %s146_s28 = int_to_ptr.vmem [resolvable:$true] %s145_s28 }
   0xd   : > { %p405_p10 = scmp.lt.s32.totalorder %s610_s17, 2  ;;  %s27_s30 = sadd.s32 1, %s606_s16 }
   0xe   : > { %p396_p9 = pneg %p693_p8  ;;  %p28_p13 = scmp.ge.s32.totalorder %s27_s30, 2 }
   0xf   : > { %p704_p12 = pnand %p405_p10, %p678_p4  ;;  %s159_s4 = sand.u32 1, %s598_s14  }
  0x10   : > { %p397_p11 = pnand %p396_p9, %p674_p3  ;;  %s374_s5 = sshll.u32 %s606_s16, 2 }
  0x11   : > { %s779_s30 = smov (%p28_p13, %s27_s30), 0  ;;  %s373_s6 = sshll.u32 %s159_s4, 3 }
  0x12   : > { %399 = dma.hbm_to_vmem [thread:$0]  (!%p397_p11), %s144_s25, 64, %s146_s28, [#allocation7]  }
  0x13   : > { %s35_s7 = ssub.s32 %s606_s16, %s779_s30  ;;  %s170_s10 = scalar_lea.hbm %s764_s0, %s374_s5 }
  0x14   : > { %p37_p0 = scmp.eq.s32.totalorder %s35_s7, 0  ;;  %s171_s11 = sshll.u32 %s170_s10, 4  ;;  %s172_s11 = int_to_ptr.hbm [resolvable:$true] %s171_s11 }
  0x15   : > { %s163_s12 = scalar_lea.vmem [#allocation3], %s373_s6  ;;  %s160_s24 = scalar_lea.sflag [#allocation4], %s159_s4 }
  0x16   : > { %s173_s21 = sshll.u32 %s163_s12, 4  ;;  %s613_s25 = smov 128   ;;  %s174_s21 = int_to_ptr.vmem [resolvable:$true] %s173_s21 }
  0x17   : > { %s721_s23 = scalar_select %p37_p0, %s598_s14, %s39_s19  }
  0x18   : > { %s614_s27 = smov 64   ;;  %s615_s28 = smov 4  }
  0x19   : > { %403 = dma.hbm_to_vmem [thread:$0]  (!%p704_p12), %s172_s11, 128, %s174_s21, %s160_s24, %s613_s25, %s614_s27, %s615_s28  }
  0x1a   : > { %185 = sbr.rel (%p693_p8) target bundleno = 325 (0x145), region = 32  ;;  %s187_s5 = sand.u32 (!%p693_p8), 1, %s594_s13  }
  0x1b   : > { %s376_s7 = sshll.u32 (!%p693_p8), %s187_s5, 3  ;;  %s188_s6 = scalar_lea.sflag (!%p693_p8), [#allocation4], %s187_s5 }
  0x1c   : > { %s191_s8 = scalar_lea.vmem (!%p693_p8), [#allocation3], %s376_s7 }
  0x1f   : > { %577 = dma.done.wait (%p685_p6), %s188_s6, 128  }
  0x20   : > { %579 = vsyncadd (%p685_p6), %s188_s6, 4294967168 }
  0x21   : > { %581 = dma.done.wait (%p674_p3), [#allocation7], 64  }
  0x22   : > { %583 = vsyncadd (%p674_p3), [#allocation7], 4294967232  ;;  %p378_p1 = scmp.ne.s32.totalorder %s602_s15, 0 }
  0x24   : > { %219 = sbr.rel (%p378_p1) target bundleno = 44 (0x2c), region = 44 }
  0x29   : > { %v616_v0 = vmov 0.0  }
  0x2a   : > { %220 = vst [vmem:[#allocation2] sm:$0xf] %v616_v0 }
  0x2b   : > { %221 = vst [vmem:[#allocation2 + $0x4] sm:$0xf] %v616_v0 }
  0x2c PF: > { %v222_v1 = vld [vmem:[%s191_s8] sm:$0xf]  ;;  %v223_v3 = vld [vmem:[%s191_s8 + $0x4] sm:$0xf]  ;;  %p379_p2 = scmp.ne.s32.totalorder %s602_s15, 1 }
  0x31   : > { %v224_v2 = vld [vmem:[#allocation2] sm:$0xf]  ;;  %233 = sbr.rel (%p379_p2) target bundleno = 319 (0x13f), region = 48 }
  0x32   : > { %v226_v4 = vadd.f32 %v224_v2, %v222_v1  ;;  %v225_v5 = vld [vmem:[#allocation2 + $0x4] sm:$0xf] }
  0x33   : > { %v227_v6 = vadd.f32 %v225_v5, %v223_v3 }
  0x34   : > { %228 = vst [vmem:[#allocation2] sm:$0xf] %v226_v4 }
  0x35   : > { %229 = vst [vmem:[#allocation2 + $0x4] sm:$0xf] %v227_v6 }
  0x36   : > { %vm236_vm0 = vcmask 1043456   ;;  %v245_v11 = vld [vmem:[#allocation6] sm:$0xf]  ;;  %v252_v13 = vlaneseq  ;;  %vm256_vm1 = vcmask 1041409   ;;  %vm258_vm2 = vcmask 31744  }
  0x37   : > { %380 = vmatpush.msk.msra.mxu0 %vm236_vm0, %v245_v11  ;;  %v463_v21 = vld [vmem:[%s766_s2] ss:$0 sm:$0xff] }
  0x38   : > { %v253_v14 = vand.u32 127, %v252_v13 }
  0x3b   : > { %v234_v7 = vld [vmem:[#allocation2] sm:$0xf] }
  0x3c   : > { %v237_v8 = vsel %vm236_vm0, %v234_v7, 0.0  ;;  %v235_v9 = vld [vmem:[#allocation2 + $0x4] sm:$0xf] }
  0x3d   : > { %238 = vadd.xlane.f32.xlu0 %v237_v8  ;;  %v240_v10 = vsel %vm236_vm0, %v235_v9, 0.0 }
  0x45   : > { %241 = vadd.xlane.f32.xlu0 %v240_v10 }
  0xb0   : > { %v239_v12 = vpop.xlane.xlu0 %238 }
  0xb1   : > { %v243_v15 = vmul.f32 0.00390625, %v239_v12 }
  0xb3   : > { %v254_v18 = vperm.slane %v243_v15, %v253_v14 }
  0xb8   : > { %v242_v16 = vpop.xlane.xlu0 %241 }
  0xb9   : > { %v244_v17 = vmul.f32 0.00390625, %v242_v16 }
  0xbb   : > { %v255_v19 = vperm.slane %v244_v17, %v253_v14 }
  0xbd   : > { %v257_v20 = vsel %vm256_vm1, %v255_v19, %v254_v18 }
  0xbe   : > { %381 = vmatmul.msk.f32.vlgmr.msra.gmra.mxu0 %vm258_vm2, %v257_v20 }
 0x13b   : > { %v281_v22 = vpop.f32.mrf.mxu0 }
 0x13c   : > { %v282_v23 = vadd.f32 %v463_v21, %v281_v22 }
 0x13e   : > { %284 = vst [vmem:[#allocation8] sm:$0x3] %v282_v23 }
 0x13f PF: > { %p407_p3 = scmp.eq.s32.totalorder %s369_s18, 1  ;;  %s295_s26 = sshll.u32 %s767_s3, 4  ;;  %s296_s26 = int_to_ptr.hbm [resolvable:$true] %s295_s26 }
 0x140   : > { %s617_s29 = smov [#allocation8]  }
 0x141   : > { %s293_s4 = sshll.u32 %s617_s29, 4  ;;  %s294_s4 = int_to_ptr.vmem [resolvable:$true] %s293_s4 }
 0x142   : > { %393 = dma.vmem_to_hbm [thread:$0]  (%p407_p3), %s294_s4, 32, %s296_s26, [#allocation5]  }
 0x143   : > { %585 = dma.done.wait (%p407_p3), [#allocation5], 32  }
 0x144   : > { %587 = vsyncadd (%p407_p3), [#allocation5], 4294967264 }
 0x145 PF: > { %s18_s17 = sadd.s32 1, %s610_s17   ;;  %s773_s12 = smov %s594_s13 }
 0x146   : > { %p15_p4 = scmp.ge.s32.totalorder %s18_s17, 4   ;;  %s774_s13 = smov %s598_s14 }
 0x147   : > { %s775_s14 = smov %s721_s23  ;;  %s776_s15 = smov %s606_s16 }
 0x148   : > { %s777_s16 = smov %s779_s30  ;;  %17 = sbr.rel (!%p15_p4) target bundleno = 6 (0x6), region = 82 }
 0x14d   :  { %309 = vsyncpa [#allocation4], 1 }
 0x14e   :  { %311 = vsyncpa [#allocation4 + $0x1], 1 }
 0x14f   :  { %312 = vsyncpa [#allocation7], 1 }
 0x150   :  { %313 = vsyncpa [#allocation5], 1 }
 0x151   :  { %315 = vsyncpa [#allocation5 + $0x1], 1 }

</bundles_post_ra>
